<compile_context>
chip_gen: v5e
topology: v5e:2x2
jax: 0.10.0
libtpu: 0.0.40
codegen_flags: <defaults>
</compile_context>

<pallas_src>
import jax
import jax.numpy as jnp
from jax.experimental import pallas as pl
from jax.experimental.pallas import tpu as pltpu


def _round_up(x, m):
    return ((x + m - 1) // m) * m


def _cdiv(a, b):
    return -(-a // b)


# ------------------------------ kernels ------------------------------------


def ffn_kernel_f32(x_ref, w1_ref, b1_ref, w2_ref, b2_ref, o_ref):
    """f32 output: accumulate directly into the VMEM-resident output tile."""
    k = pl.program_id(1)

    @pl.when(k == 0)
    def _init():
        o_ref[...] = jnp.zeros_like(o_ref)

    # First matmul contracts the *full* d_model, so each k-slab of the hidden
    # activation is complete and bias + ReLU can be applied per slab.
    h = jnp.dot(x_ref[...], w1_ref[...], preferred_element_type=jnp.float32)
    h = jnp.maximum(h + b1_ref[...], 0.0)
    o_ref[...] += jnp.dot(h, w2_ref[...], preferred_element_type=jnp.float32)

    @pl.when(k == pl.num_programs(1) - 1)
    def _finalize():
        o_ref[...] += b2_ref[...]          # b2 added exactly once


def ffn_kernel_acc(x_ref, w1_ref, b1_ref, w2_ref, b2_ref, o_ref, acc_ref):
    """Non-f32 (e.g. bf16) output: f32 VMEM accumulator, cast on last step."""
    k = pl.program_id(1)

    @pl.when(k == 0)
    def _init():
        acc_ref[...] = jnp.zeros_like(acc_ref)

    h = jnp.dot(x_ref[...], w1_ref[...], preferred_element_type=jnp.float32)
    h = jnp.maximum(h + b1_ref[...].astype(jnp.float32), 0.0)
    acc_ref[...] += jnp.dot(h.astype(w2_ref.dtype), w2_ref[...],
                            preferred_element_type=jnp.float32)

    @pl.when(k == pl.num_programs(1) - 1)
    def _finalize():
        o_ref[...] = (acc_ref[...]
                      + b2_ref[...].astype(jnp.float32)).astype(o_ref.dtype)


# --------------------------- tile selection ---------------------------------


def _chip_defaults():
    """Generation-aware VMEM budget and tile targets."""
    kind = ""
    try:
        kind = jax.devices()[0].device_kind.lower()
    except Exception:
        pass
    if "7" in kind:
        # v7x: 64 MiB physical VMEM (leave headroom), 2 TensorCores/chip,
        # HBM balance ~310 FLOP/byte -> tm=512 clears it.
        return dict(vmem_budget=48 << 20, tm=512, tk=512, min_row_tiles=2)
    if "v6" in kind:
        # v6e: 128 MiB VMEM, balance ~680 FLOP/byte -> big row tiles.
        return dict(vmem_budget=100 << 20, tm=1024, tk=512, min_row_tiles=1)
    if "v5" in kind:
        # v5e/v5p: 128 MiB VMEM, balance ~240 FLOP/byte.
        return dict(vmem_budget=100 << 20, tm=512, tk=512, min_row_tiles=1)
    # Unknown chip: conservative.
    return dict(vmem_budget=48 << 20, tm=512, tk=512, min_row_tiles=1)


def _vmem_step_bytes(tm, tk, dp, itemsize, use_scratch):
    """Rough per-step VMEM working set (double-buffered operands + output)."""
    buf = 2 * itemsize * (tm * dp        # x tile
                          + dp * tk      # w1 slab
                          + 8 * tk       # b1 slab (sublane-padded)
                          + tk * dp      # w2 slab
                          + 8 * dp       # b2
                          + tm * dp)     # output tile
    if use_scratch:
        buf += 4 * tm * dp               # f32 accumulator
    return buf


def _balanced_tiles(total, target, unit):
    """Split `total` into equal tiles of size <= ~target, multiples of `unit`.

    Returns (tile, padded_total, num_tiles) -- avoids e.g. padding 300 rows
    up to 512 when two 152-row tiles would do.
    """
    total_u = _round_up(max(total, unit), unit)
    n = max(1, _cdiv(total_u, max(target, unit)))
    tile = _round_up(_cdiv(total_u, n), unit)
    return tile, tile * n, n


def _select_tiles(M, dp, int_dim, itemsize, use_scratch, cfg, tm_override):
    budget = cfg["vmem_budget"]

    def fits(tm, tk):
        return _vmem_step_bytes(tm, tk, dp, itemsize, use_scratch) <= budget

    tk_eff, ip, n_k = _balanced_tiles(int_dim, cfg["tk"], 128)

    if tm_override is None:
        Mp8 = _round_up(max(M, 8), 8)
        # Whole-batch-resident schedule: weights stream exactly once.  Skip it
        # on v7x when M is big enough (>=512 rows) to feed both TensorCores.
        if fits(Mp8, tk_eff) and (cfg["min_row_tiles"] == 1 or Mp8 < 512):
            return Mp8, Mp8, 1, tk_eff, ip, n_k
        n_m = max(cfg["min_row_tiles"], _cdiv(M, cfg["tm"]))
    else:
        n_m = max(1, _cdiv(M, tm_override))
    tm_eff = _round_up(_cdiv(M, n_m), 8)
    Mp = tm_eff * n_m

    # Overflowing the VMEM budget: shrink tk first (only amortizes the
    # ~0.35us/step grid overhead), then tm (which sets HBM intensity).
    while not fits(tm_eff, tk_eff) and tk_eff > 128:
        tk_eff, ip, n_k = _balanced_tiles(int_dim, tk_eff // 2, 128)
    while not fits(tm_eff, tk_eff) and tm_eff > 128:
        n_m += 1
        tm_eff = _round_up(_cdiv(M, n_m), 8)
        Mp = tm_eff * n_m

    return tm_eff, Mp, n_m, tk_eff, ip, n_k


# ------------------------------ wrapper -------------------------------------


def ffn_pallas(x, w1, b1, w2, b2, *, tm=None, tk=None):
    """x: (..., d_model). Returns the same shape. f32 or bf16 inputs."""
    orig_shape = x.shape
    d_model = orig_shape[-1]
    int_dim = w1.shape[1]
    x2d = x.reshape(-1, d_model)
    M = x2d.shape[0]

    dtype = x.dtype
    itemsize = jnp.dtype(dtype).itemsize
    use_scratch = jnp.dtype(dtype) != jnp.dtype(jnp.float32)

    cfg = _chip_defaults()
    if tk is not None:
        cfg = dict(cfg, tk=tk)

    dp = _round_up(d_model, 128)           # lane-dense feature dim
    tm_eff, Mp, n_m, tk_eff, ip, n_k = _select_tiles(
        M, dp, int_dim, itemsize, use_scratch, cfg, tm)

    # ---- padding (zero padding contributes exactly 0; skipped if aligned) --
    if Mp == M and dp == d_model:
        x_p = x2d
    else:
        x_p = jnp.zeros((Mp, dp), dtype).at[:M, :d_model].set(x2d)
    if dp == d_model and ip == int_dim:
        w1_p, w2_p = w1, w2
        b1_p, b2_p = b1.reshape(1, int_dim), b2.reshape(1, d_model)
    else:
        w1_p = jnp.zeros((dp, ip), w1.dtype).at[:d_model, :int_dim].set(w1)
        b1_p = jnp.zeros((1, ip), b1.dtype).at[0, :int_dim].set(b1)
        w2_p = jnp.zeros((ip, dp), w2.dtype).at[:int_dim, :d_model].set(w2)
        b2_p = jnp.zeros((1, dp), b2.dtype).at[0, :d_model].set(b2)

    grid = (n_m, n_k)
    kernel = ffn_kernel_acc if use_scratch else ffn_kernel_f32
    scratch = [pltpu.VMEM((tm_eff, dp), jnp.float32)] if use_scratch else []

    cost = pl.CostEstimate(
        flops=2 * Mp * dp * ip * 2,        # two matmuls
        transcendentals=0,
        bytes_accessed=(
            (w1_p.size + b1_p.size + w2_p.size) * itemsize * n_m  # re-streamed
            + (x_p.size + b2_p.size + Mp * dp) * itemsize))

    out = pl.pallas_call(
        kernel,
        out_shape=jax.ShapeDtypeStruct((Mp, dp), dtype),
        grid_spec=pltpu.PrefetchScalarGridSpec(
            num_scalar_prefetch=0,
            grid=grid,
            in_specs=[
                pl.BlockSpec((tm_eff, dp), lambda i, k: (i, 0)),   # x rows
                pl.BlockSpec((dp, tk_eff), lambda i, k: (0, k)),   # w1 k-slab
                pl.BlockSpec((1, tk_eff), lambda i, k: (0, k)),    # b1 k-slab
                pl.BlockSpec((tk_eff, dp), lambda i, k: (k, 0)),   # w2 k-slab
                pl.BlockSpec((1, dp), lambda i, k: (0, 0)),        # b2 (tiny)
            ],
            out_specs=pl.BlockSpec((tm_eff, dp), lambda i, k: (i, 0)),
            scratch_shapes=scratch,
        ),
        compiler_params=pltpu.CompilerParams(
            dimension_semantics=("parallel", "arbitrary"),
            vmem_limit_bytes=cfg["vmem_budget"],
        ),
        cost_estimate=cost,
    )(x_p, w1_p, b1_p, w2_p, b2_p)

    return out[:M, :d_model].reshape(orig_shape)


# -------------------------- params / reference -------------------------------


def init_ffn_params(key, d_model, int_dim, dtype=jnp.float32):
    """Deterministic init matching nn.Linear shapes (stored transposed)."""
    k1, k2, k3, k4 = jax.random.split(key, 4)
    lim1 = 1.0 / (d_model ** 0.5)
    lim2 = 1.0 / (int_dim ** 0.5)
    w1 = jax.random.uniform(k1, (d_model, int_dim), dtype, -lim1, lim1)
    b1 = jax.random.uniform(k2, (int_dim,), dtype, -lim1, lim1)
    w2 = jax.random.uniform(k3, (int_dim, d_model), dtype, -lim2, lim2)
    b2 = jax.random.uniform(k4, (d_model,), dtype, -lim2, lim2)
    return w1, b1, w2, b2


def ffn_reference(x, w1, b1, w2, b2):
    h = jnp.maximum(x @ w1 + b1, 0.0)
    return h @ w2 + b2


if __name__ == "__main__":
    key = jax.random.PRNGKey(0)

    # --- test 1: small shapes from the module spec (f32, single tile) -------
    batch, seq, d_model, int_dim = 2, 8, 32, 64
    kx, kp, key = jax.random.split(key, 3)
    x = jax.random.normal(kx, (batch, seq, d_model), jnp.float32)
    w1, b1, w2, b2 = init_ffn_params(kp, d_model, int_dim)
    out = jax.block_until_ready(ffn_pallas(x, w1, b1, w2, b2))
    ref = ffn_reference(x, w1, b1, w2, b2)
    assert out.shape == (batch, seq, d_model)
    assert jnp.allclose(out, ref, atol=1e-5, rtol=1e-5)

    # --- test 2: multi row-tile + multi k-step f32 path (direct accumulate) -
    batch2, seq2, dm2, id2 = 2, 160, 128, 384      # M=320 -> 3 row tiles of 112
    kx2, kp2, key = jax.random.split(key, 3)
    x2 = jax.random.normal(kx2, (batch2, seq2, dm2), jnp.float32)
    w1b, b1b, w2b, b2b = init_ffn_params(kp2, dm2, id2)
    out2 = jax.block_until_ready(ffn_pallas(x2, w1b, b1b, w2b, b2b, tm=128, tk=128))
    ref2 = ffn_reference(x2, w1b, b1b, w2b, b2b)
    assert out2.shape == (batch2, seq2, dm2)
    assert jnp.allclose(out2, ref2, atol=1e-4, rtol=1e-4)

    # --- test 3: bf16 path (scratch accumulator, multi k-step) --------------
    x3 = x2[:, :8].astype(jnp.bfloat16)
    p3 = [p.astype(jnp.bfloat16) for p in (w1b, b1b, w2b, b2b)]
    out3 = jax.block_until_ready(ffn_pallas(x3, *p3, tk=128))
    ref3 = ffn_reference(x3.astype(jnp.float32),
                         *[p.astype(jnp.float32) for p in p3])
    assert out3.shape == x3.shape
    assert jnp.allclose(out3.astype(jnp.float32), ref3, atol=3e-2, rtol=3e-2)

    print("KERNEL_OK")
</pallas_src>

<mosaic_0001>
module attributes {stable_mosaic.version = 11 : i64} {
  func.func @ffn_kernel_f32(%arg0: i32, %arg1: i32, %arg2: memref<16x128xf32, #tpu.memory_space<vmem>>, %arg3: memref<128x128xf32, #tpu.memory_space<vmem>>, %arg4: memref<1x128xf32, #tpu.memory_space<vmem>>, %arg5: memref<128x128xf32, #tpu.memory_space<vmem>>, %arg6: memref<1x128xf32, #tpu.memory_space<vmem>>, %arg7: memref<16x128xf32, #tpu.memory_space<vmem>>) attributes {dimension_semantics = [#tpu.dimension_semantics<parallel>, #tpu.dimension_semantics<arbitrary>], iteration_bounds = array<i64: 1, 1>, scalar_prefetch = 0 : i64, scratch_operands = 0 : i64, tpu.core_type = #tpu.core_type<tc>, window_params = [{transform_indices = @transform_0, window_bounds = array<i64: 16, 128>}, {transform_indices = @transform_1, window_bounds = array<i64: 128, 128>}, {transform_indices = @transform_2, window_bounds = array<i64: 1, 128>}, {transform_indices = @transform_3, window_bounds = array<i64: 128, 128>}, {pipeline_mode = #tpu.pipeline_mode<synchronous>, transform_indices = @transform_4, window_bounds = array<i64: 1, 128>}, {transform_indices = @transform_5, window_bounds = array<i64: 16, 128>}]} {
    %c0_i32 = arith.constant 0 : i32
    %0 = arith.cmpi eq, %arg1, %c0_i32 : i32
    %1 = arith.extui %0 : i1 to i32
    %c0_i32_0 = arith.constant 0 : i32
    %2 = arith.cmpi ne, %1, %c0_i32_0 : i32
    scf.if %2 {
      %cst_16 = arith.constant 0.000000e+00 : f32
      %19 = vector.broadcast %cst_16 : f32 to vector<16x128xf32>
      %c0_17 = arith.constant 0 : index
      %c0_18 = arith.constant 0 : index
      %20 = vector.load %arg7[%c0_17, %c0_18] : memref<16x128xf32, #tpu.memory_space<vmem>>, vector<16x128xf32>
      tpu.vector_store %arg7[%c0_17, %c0_18], %19 {strides = array<i32>} : memref<16x128xf32, #tpu.memory_space<vmem>>, vector<16x128xf32>,
    } else {
    }
    %c0 = arith.constant 0 : index
    %c0_1 = arith.constant 0 : index
    %3 = vector.load %arg2[%c0, %c0_1] : memref<16x128xf32, #tpu.memory_space<vmem>>, vector<16x128xf32>
    %c0_2 = arith.constant 0 : index
    %c0_3 = arith.constant 0 : index
    %4 = vector.load %arg3[%c0_2, %c0_3] : memref<128x128xf32, #tpu.memory_space<vmem>>, vector<128x128xf32>
    %cst = arith.constant dense<0.000000e+00> : vector<16x128xf32>
    %5 = tpu.matmul %3, %4, %cst {dimension_numbers = #tpu.dot_dimension_numbers<[1], [0], [0], [1], [0, 0, 1, 1], [], []>} : vector<16x128xf32>, vector<128x128xf32>, vector<16x128xf32> -> vector<16x128xf32>
    %c0_4 = arith.constant 0 : index
    %c0_5 = arith.constant 0 : index
    %6 = vector.load %arg4[%c0_4, %c0_5] : memref<1x128xf32, #tpu.memory_space<vmem>>, vector<1x128xf32>
    %7 = vector.broadcast %6 : vector<1x128xf32> to vector<16x128xf32>
    %8 = arith.addf %5, %7 : vector<16x128xf32>
    %cst_6 = arith.constant 0.000000e+00 : f32
    %9 = vector.broadcast %cst_6 : f32 to vector<16x128xf32>
    %10 = arith.maximumf %8, %9 : vector<16x128xf32>
    %c0_7 = arith.constant 0 : index
    %c0_8 = arith.constant 0 : index
    %11 = vector.load %arg7[%c0_7, %c0_8] : memref<16x128xf32, #tpu.memory_space<vmem>>, vector<16x128xf32>
    %c0_9 = arith.constant 0 : index
    %c0_10 = arith.constant 0 : index
    %12 = vector.load %arg5[%c0_9, %c0_10] : memref<128x128xf32, #tpu.memory_space<vmem>>, vector<128x128xf32>
    %cst_11 = arith.constant dense<0.000000e+00> : vector<16x128xf32>
    %13 = tpu.matmul %10, %12, %cst_11 {dimension_numbers = #tpu.dot_dimension_numbers<[1], [0], [0], [1], [0, 0, 1, 1], [], []>} : vector<16x128xf32>, vector<128x128xf32>, vector<16x128xf32> -> vector<16x128xf32>
    %14 = arith.addf %11, %13 : vector<16x128xf32>
    %c0_12 = arith.constant 0 : index
    %c0_13 = arith.constant 0 : index
    %15 = vector.load %arg7[%c0_12, %c0_13] : memref<16x128xf32, #tpu.memory_space<vmem>>, vector<16x128xf32>
    tpu.vector_store %arg7[%c0_12, %c0_13], %14 {strides = array<i32>} : memref<16x128xf32, #tpu.memory_space<vmem>>, vector<16x128xf32>,
    %c0_i32_14 = arith.constant 0 : i32
    %16 = arith.cmpi eq, %arg1, %c0_i32_14 : i32
    %17 = arith.extui %16 : i1 to i32
    %c0_i32_15 = arith.constant 0 : i32
    %18 = arith.cmpi ne, %17, %c0_i32_15 : i32
    scf.if %18 {
      %c0_16 = arith.constant 0 : index
      %c0_17 = arith.constant 0 : index
      %19 = vector.load %arg7[%c0_16, %c0_17] : memref<16x128xf32, #tpu.memory_space<vmem>>, vector<16x128xf32>
      %c0_18 = arith.constant 0 : index
      %c0_19 = arith.constant 0 : index
      %20 = vector.load %arg6[%c0_18, %c0_19] : memref<1x128xf32, #tpu.memory_space<vmem>>, vector<1x128xf32>
      %21 = vector.broadcast %20 : vector<1x128xf32> to vector<16x128xf32>
      %22 = arith.addf %19, %21 : vector<16x128xf32>
      %c0_20 = arith.constant 0 : index
      %c0_21 = arith.constant 0 : index
      %23 = vector.load %arg7[%c0_20, %c0_21] : memref<16x128xf32, #tpu.memory_space<vmem>>, vector<16x128xf32>
      tpu.vector_store %arg7[%c0_20, %c0_21], %22 {strides = array<i32>} : memref<16x128xf32, #tpu.memory_space<vmem>>, vector<16x128xf32>,
    } else {
    }
    return
  }
  func.func @transform_0(%arg0: i32, %arg1: i32) -> (i32, i32) {
    %c0_i32 = arith.constant 0 : i32
    %c0_i32_0 = arith.constant 0 : i32
    return %arg0, %c0_i32 : i32, i32
  }
  func.func @transform_1(%arg0: i32, %arg1: i32) -> (i32, i32) {
    %c0_i32 = arith.constant 0 : i32
    %c0_i32_0 = arith.constant 0 : i32
    return %c0_i32, %arg1 : i32, i32
  }
  func.func @transform_2(%arg0: i32, %arg1: i32) -> (i32, i32) {
    %c0_i32 = arith.constant 0 : i32
    %c0_i32_0 = arith.constant 0 : i32
    return %c0_i32, %arg1 : i32, i32
  }
  func.func @transform_3(%arg0: i32, %arg1: i32) -> (i32, i32) {
    %c0_i32 = arith.constant 0 : i32
    %c0_i32_0 = arith.constant 0 : i32
    return %arg1, %c0_i32 : i32, i32
  }
  func.func @transform_4(%arg0: i32, %arg1: i32) -> (i32, i32) {
    %c0_i32 = arith.constant 0 : i32
    %c0_i32_0 = arith.constant 0 : i32
    %c0_i32_1 = arith.constant 0 : i32
    return %c0_i32, %c0_i32_0 : i32, i32
  }
  func.func @transform_5(%arg0: i32, %arg1: i32) -> (i32, i32) {
    %c0_i32 = arith.constant 0 : i32
    %c0_i32_0 = arith.constant 0 : i32
    return %arg0, %c0_i32 : i32, i32
  }
}

</mosaic_0001>

<bundles_post_ra>
// kernel: tpu_custom_call.1
= control target key start
LH: loop header
LB: loop body
LE: loop exit
PB: predicated region body
PF: predicated region fallthrough
CT: control target
= control target key end

     0   :  { %10 = vsyncpa [#allocation3], 0  ;;  %s408_s0 = inlined_call_operand.hbm [shape: f32[16,128], index: 0, kind: input, shape index: {}]   ;;  %s409_s1 = inlined_call_operand.hbm [shape: f32[128,128], index: 1, kind: input, shape index: {}]   ;;  %s410_s2 = inlined_call_operand.vmem [shape: f32[1,128], index: 2, kind: input, shape index: {}]   ;;  %s411_s3 = inlined_call_operand.hbm [shape: f32[128,128], index: 3, kind: input, shape index: {}]   ;;  %s412_s4 = inlined_call_operand.vmem [shape: f32[1,128], index: 4, kind: input, shape index: {}]   ;;  %s413_s5 = inlined_call_operand.hbm [shape: f32[16,128], index: 5, kind: output, shape index: {}]  }
   0x1   :  { %11 = vsyncpa [#allocation6], 0 }
   0x2   :  { %12 = vsyncpa [#allocation4], 0  ;;  %s30_s20 = sshll.u32 %s409_s1, 4  ;;  %s342_s21 = smov [#allocation5]   ;;  %s31_s20 = int_to_ptr.hbm [resolvable:$true] %s30_s20 }
   0x3   :  { %s32_s22 = sshll.u32 %s342_s21, 4  ;;  %s17_s25 = sshll.u32 %s408_s0, 4  ;;  %s33_s22 = int_to_ptr.vmem [resolvable:$true] %s32_s22  ;;  %s18_s25 = int_to_ptr.hbm [resolvable:$true] %s17_s25 }
   0x4   :  { %s343_s26 = smov 128   ;;  %s344_s27 = smov 8  }
   0x5   :  { %38 = dma.hbm_to_vmem [thread:$0]  %s31_s20, 2048, %s33_s22, [#allocation6], %s343_s26, %s343_s26, %s344_s27  }
   0x6   :  { %s345_s28 = smov [#allocation2]   ;;  %s45_s1 = sshll.u32 %s411_s3, 4  ;;  %s46_s1 = int_to_ptr.hbm [resolvable:$true] %s45_s1 }
   0x7   :  { %s19_s29 = sshll.u32 %s345_s28, 4  ;;  %s346_s0 = smov [#allocation7]   ;;  %s20_s29 = int_to_ptr.vmem [resolvable:$true] %s19_s29 }
   0x8   :  { %25 = dma.hbm_to_vmem [thread:$0]  %s18_s25, 256, %s20_s29, [#allocation3], %s343_s26, %s343_s26, %s344_s27  }
   0x9   :  { %s47_s7 = sshll.u32 %s346_s0, 4  ;;  %s48_s7 = int_to_ptr.vmem [resolvable:$true] %s47_s7 }
   0xa   :  { %53 = dma.hbm_to_vmem [thread:$0]  %s46_s1, 2048, %s48_s7, [#allocation6], %s343_s26, %s343_s26, %s344_s27  }
   0xb   :  { %336 = dma.done.wait [#allocation3], 256  }
   0xc   :  { %337 = vsyncadd [#allocation3], 4294967040 }
   0xd   :  { %338 = dma.done.wait [#allocation6], 4096  }
   0xe   :  { %339 = vsyncadd [#allocation6], 4294963200  ;;  %v91_v0 = vld [vmem:[#allocation5 + $0x78] sm:$0xff]  ;;  %v90_v1 = vld [vmem:[#allocation5 + $0x70] sm:$0xff]  ;;  %s347_s11 = smov [#allocation8]   ;;  %s185_s14 = sshll.u32 %s413_s5, 4  ;;  %s186_s14 = int_to_ptr.hbm [resolvable:$true] %s185_s14 }
   0xf   :  { %199 = vmatpush.msra.mxu2 %v91_v0  ;;  %96 = vmatpush.msra.mxu0 %v91_v0  ;;  %v89_v2 = vld [vmem:[#allocation5 + $0x68] sm:$0xff]  ;;  %v88_v3 = vld [vmem:[#allocation5 + $0x60] sm:$0xff]  ;;  %v87_v4 = vld [vmem:[#allocation5 + $0x58] sm:$0xff]  ;;  %s183_s12 = sshll.u32 %s347_s11, 4  ;;  %s184_s12 = int_to_ptr.vmem [resolvable:$true] %s183_s12 }
  0x10   :  { %v138_v5 = vld [vmem:[#allocation7 + $0x78] sm:$0xff]  ;;  %v137_v6 = vld [vmem:[#allocation7 + $0x70] sm:$0xff]  ;;  %v136_v8 = vld [vmem:[#allocation7 + $0x68] sm:$0xff] }
  0x11   :  { %200 = vmatpush.msra.mxu2 %v90_v1  ;;  %97 = vmatpush.msra.mxu0 %v90_v1  ;;  %v86_v7 = vld [vmem:[#allocation5 + $0x50] sm:$0xff]  ;;  %v85_v9 = vld [vmem:[#allocation5 + $0x48] sm:$0xff]  ;;  %v135_v10 = vld [vmem:[#allocation7 + $0x60] sm:$0xff] }
  0x12   :  { %215 = vmatpush.msra.mxu3 %v138_v5  ;;  %139 = vmatpush.msra.mxu1 %v138_v5  ;;  %v84_v11 = vld [vmem:[#allocation5 + $0x40] sm:$0xff]  ;;  %v134_v12 = vld [vmem:[#allocation7 + $0x58] sm:$0xff]  ;;  %v133_v14 = vld [vmem:[#allocation7 + $0x50] sm:$0xff] }
  0x13   :  { %201 = vmatpush.msra.mxu2 %v89_v2  ;;  %98 = vmatpush.msra.mxu0 %v89_v2  ;;  %v83_v13 = vld [vmem:[#allocation5 + $0x38] sm:$0xff]  ;;  %v82_v15 = vld [vmem:[#allocation5 + $0x30] sm:$0xff]  ;;  %v132_v16 = vld [vmem:[#allocation7 + $0x48] sm:$0xff] }
  0x14   :  { %216 = vmatpush.msra.mxu3 %v137_v6  ;;  %140 = vmatpush.msra.mxu1 %v137_v6  ;;  %v81_v17 = vld [vmem:[#allocation5 + $0x28] sm:$0xff]  ;;  %v131_v18 = vld [vmem:[#allocation7 + $0x40] sm:$0xff]  ;;  %v130_v20 = vld [vmem:[#allocation7 + $0x38] sm:$0xff] }
  0x15   :  { %202 = vmatpush.msra.mxu2 %v88_v3  ;;  %99 = vmatpush.msra.mxu0 %v88_v3  ;;  %v80_v19 = vld [vmem:[#allocation5 + $0x20] sm:$0xff]  ;;  %v79_v21 = vld [vmem:[#allocation5 + $0x18] sm:$0xff]  ;;  %v129_v22 = vld [vmem:[#allocation7 + $0x30] sm:$0xff] }
  0x16   :  { %217 = vmatpush.msra.mxu3 %v136_v8  ;;  %141 = vmatpush.msra.mxu1 %v136_v8  ;;  %v78_v23 = vld [vmem:[#allocation5 + $0x10] sm:$0xff]  ;;  %v128_v24 = vld [vmem:[#allocation7 + $0x28] sm:$0xff]  ;;  %v127_v26 = vld [vmem:[#allocation7 + $0x20] sm:$0xff] }
  0x17   :  { %203 = vmatpush.msra.mxu2 %v87_v4  ;;  %100 = vmatpush.msra.mxu0 %v87_v4  ;;  %v77_v25 = vld [vmem:[#allocation5 + $0x8] sm:$0xff]  ;;  %v76_v27 = vld [vmem:[#allocation5] sm:$0xff]  ;;  %v75_v28 = vld [vmem:[#allocation2 + $0x8] sm:$0xff] }
  0x18   :  { %218 = vmatpush.msra.mxu3 %v135_v10  ;;  %142 = vmatpush.msra.mxu1 %v135_v10  ;;  %v74_v29 = vld [vmem:[#allocation2] sm:$0xff]  ;;  %v126_v30 = vld [vmem:[#allocation7 + $0x18] sm:$0xff]  ;;  %v124_v32 = vld [vmem:[#allocation7 + $0x8] sm:$0xff] }
  0x19   :  { %204 = vmatpush.msra.mxu2 %v86_v7  ;;  %101 = vmatpush.msra.mxu0 %v86_v7  ;;  %v125_v31 = vld [vmem:[#allocation7 + $0x10] sm:$0xff]  ;;  %v123_v33 = vld [vmem:[#allocation7] sm:$0xff] }
  0x1a   :  { %219 = vmatpush.msra.mxu3 %v134_v12  ;;  %143 = vmatpush.msra.mxu1 %v134_v12  ;;  %v238_v34 = vld [vmem:[%s410_s2] ss:$0 sm:$0xff] }
  0x1b   :  { %205 = vmatpush.msra.mxu2 %v85_v9  ;;  %102 = vmatpush.msra.mxu0 %v85_v9  ;;  %v239_v41 = vld [vmem:[%s412_s4] ss:$0 sm:$0xff] }
  0x1c   :  { %220 = vmatpush.msra.mxu3 %v133_v14  ;;  %144 = vmatpush.msra.mxu1 %v133_v14 }
  0x1d   :  { %206 = vmatpush.msra.mxu2 %v84_v11  ;;  %103 = vmatpush.msra.mxu0 %v84_v11 }
  0x1e   :  { %221 = vmatpush.msra.mxu3 %v132_v16  ;;  %145 = vmatpush.msra.mxu1 %v132_v16 }
  0x1f   :  { %207 = vmatpush.msra.mxu2 %v83_v13  ;;  %104 = vmatpush.msra.mxu0 %v83_v13 }
  0x20   :  { %222 = vmatpush.msra.mxu3 %v131_v18  ;;  %146 = vmatpush.msra.mxu1 %v131_v18 }
  0x21   :  { %208 = vmatpush.msra.mxu2 %v82_v15  ;;  %105 = vmatpush.msra.mxu0 %v82_v15 }
  0x22   :  { %223 = vmatpush.msra.mxu3 %v130_v20  ;;  %147 = vmatpush.msra.mxu1 %v130_v20 }
  0x23   :  { %209 = vmatpush.msra.mxu2 %v81_v17  ;;  %106 = vmatpush.msra.mxu0 %v81_v17 }
  0x24   :  { %224 = vmatpush.msra.mxu3 %v129_v22  ;;  %148 = vmatpush.msra.mxu1 %v129_v22 }
  0x25   :  { %210 = vmatpush.msra.mxu2 %v80_v19  ;;  %107 = vmatpush.msra.mxu0 %v80_v19 }
  0x26   :  { %225 = vmatpush.msra.mxu3 %v128_v24  ;;  %149 = vmatpush.msra.mxu1 %v128_v24 }
  0x27   :  { %211 = vmatpush.msra.mxu2 %v79_v21  ;;  %108 = vmatpush.msra.mxu0 %v79_v21 }
  0x28   :  { %226 = vmatpush.msra.mxu3 %v127_v26  ;;  %150 = vmatpush.msra.mxu1 %v127_v26 }
  0x29   :  { %212 = vmatpush.msra.mxu2 %v78_v23  ;;  %109 = vmatpush.msra.mxu0 %v78_v23 }
  0x2a   :  { %227 = vmatpush.msra.mxu3 %v126_v30  ;;  %151 = vmatpush.msra.mxu1 %v126_v30 }
  0x2b   :  { %213 = vmatpush.msra.mxu2 %v77_v25  ;;  %110 = vmatpush.msra.mxu0 %v77_v25 }
  0x2c   :  { %228 = vmatpush.msra.mxu3 %v125_v31  ;;  %152 = vmatpush.msra.mxu1 %v125_v31 }
  0x2d   :  { %214 = vmatpush.msra.mxu2 %v76_v27  ;;  %111 = vmatpush.msra.mxu0 %v76_v27 }
  0x2e   :  { %115 = vmatmul.f32.vlgmr.msra.gmra.mxu2 %v75_v28  ;;  %112 = vmatmul.f32.vlgmr.msra.gmra.mxu0 %v74_v29 }
  0x2f   :  { %229 = vmatpush.msra.mxu3 %v124_v32  ;;  %153 = vmatpush.msra.mxu1 %v124_v32 }
  0x31   :  { %230 = vmatpush.msra.mxu3 %v123_v33  ;;  %154 = vmatpush.msra.mxu1 %v123_v33 }
  0xab   :  { %v113_v35 = vpop.f32.mrf.mxu0 }
  0xac   :  { %v114_v36 = vadd.f32 %v238_v34, %v113_v35 }
  0xae   :  { %v119_v37 = vmax.f32 %v114_v36, 0.0 }
  0xb0   :  { %155 = vmatmul.f32.vlgmr.msra.gmra.mxu1 %v119_v37 }
  0xb1   :  { %v116_v38 = vpop.f32.mrf.mxu2 }
  0xb2   :  { %v117_v39 = vadd.f32 %v238_v34, %v116_v38 }
  0xb4   :  { %v120_v40 = vmax.f32 %v117_v39, 0.0 }
  0xb6   :  { %158 = vmatmul.f32.vlgmr.msra.gmra.mxu3 %v120_v40 }
 0x12d   :  { %v156_v42 = vpop.f32.mrf.mxu1 }
 0x12e   :  { %v175_v43 = vadd.f32 %v239_v41, %v156_v42 }
 0x130   :  { %177 = vst [vmem:[#allocation8] sm:$0xff] %v175_v43 }
 0x139   :  { %v159_v44 = vpop.f32.mrf.mxu3 }
 0x13a   :  { %v176_v45 = vadd.f32 %v239_v41, %v159_v44 }
 0x13c   :  { %178 = vst [vmem:[#allocation8 + $0x8] sm:$0xff] %v176_v45 }
 0x13d   :  { %191 = dma.vmem_to_hbm [thread:$0]  %s184_s12, 256, %s186_s14, [#allocation4], %s343_s26, %s343_s26, %s344_s27  }
 0x13e   :  { %340 = dma.done.wait [#allocation4], 256  }
 0x13f   :  { %341 = vsyncadd [#allocation4], 4294967040 }
 0x140   :  { %196 = vsyncpa [#allocation3], 1 }
 0x141   :  { %197 = vsyncpa [#allocation6], 1 }
 0x142   :  { %198 = vsyncpa [#allocation4], 1 }

</bundles_post_ra>
